<compile_context>
chip_gen: v7x
topology: tpu7x:2x2x1
jax: 0.10.0
libtpu: 0.0.40
codegen_flags: <defaults>
</compile_context>

<pallas_src>
import jax
import jax.numpy as jnp
from jax import lax
from jax.experimental import pallas as pl
from jax.experimental.pallas import tpu as pltpu


def lstm_fc_kernel(x_ref, wih_ref, whh_ref, b_ref, fcw_ref, fcb_ref,
                   h0_ref, c0_ref,
                   out_ref, hn_ref, cn_ref):
    """Whole sequence processed in one kernel invocation (everything in VMEM)."""
    L = x_ref.shape[0]
    H = h0_ref.shape[1]

    # Hot path 1: batched input projection for all timesteps on the MXU.
    # (L, 4H) f32 -- at L=8, H=32 this is a single vreg-sized value.
    x_gates = (jnp.dot(x_ref[...], wih_ref[...],
                       preferred_element_type=jnp.float32) + b_ref[...])

    # Load recurrent weight once; carries live in vregs, not VMEM.
    whh = whh_ref[...]          # (H, 4H)
    h = h0_ref[...]             # (1, H)
    c = c0_ref[...]             # (1, H)

    # Hot path 2: sequential LSTM recurrence, fully unrolled (L static, small).
    # For long sequences this should be time-chunked via a grid axis instead
    # of a full unroll (keeps VMEM/unroll bounded); not needed at L=8.
    for t in range(L):
        gates = x_gates[t:t + 1, :] + jnp.dot(
            h, whh, preferred_element_type=jnp.float32)           # (1, 4H)
        # Two full-vreg transcendentals instead of four partial ones.
        sig = jax.nn.sigmoid(gates)
        th = jnp.tanh(gates)
        i_g = sig[:, 0 * H:1 * H]
        f_g = sig[:, 1 * H:2 * H]
        o_g = sig[:, 3 * H:4 * H]
        g_g = th[:, 2 * H:3 * H]
        c = f_g * c + i_g * g_g
        h = o_g * jnp.tanh(c)

    # Single write-back of the final carries.
    hn_ref[...] = h
    cn_ref[...] = c
    # Final fc on the last hidden state (== out[-1, :]).
    out_ref[...] = (jnp.dot(h, fcw_ref[...],
                            preferred_element_type=jnp.float32) + fcb_ref[...])


def rnn_model_forward(x, params, hidden):
    """Pallas equivalent of rnn_model.forward(x, hidden)."""
    h0, c0 = hidden
    H = params["w_hh"].shape[1]
    O = params["fc_w"].shape[0]

    # Glue: transpose / combine parameters for row-vector matmuls.
    wih_t = params["w_ih"].T                                 # (I, 4H)
    whh_t = params["w_hh"].T                                 # (H, 4H)
    b = (params["b_ih"] + params["b_hh"]).reshape(1, 4 * H)  # (1, 4H)
    fcw_t = params["fc_w"].T                                 # (H, O)
    fcb = params["fc_b"].reshape(1, O)                       # (1, O)

    vmem = pl.BlockSpec(memory_space=pltpu.MemorySpace.VMEM)
    out, hn, cn = pl.pallas_call(
        lstm_fc_kernel,
        out_shape=(jax.ShapeDtypeStruct((1, O), jnp.float32),
                   jax.ShapeDtypeStruct((1, H), jnp.float32),
                   jax.ShapeDtypeStruct((1, H), jnp.float32)),
        in_specs=[vmem] * 8,
        out_specs=(vmem, vmem, vmem),
    )(x, wih_t, whh_t, b, fcw_t, fcb, h0, c0)

    return out.reshape(O), (hn, cn)


def rnn_model_forward_ref(x, params, hidden):
    """Pure-JAX reference matching PyTorch nn.LSTM (unbatched) + nn.Linear."""
    h, c = hidden
    H = params["w_hh"].shape[1]

    def step(carry, xt):
        h, c = carry
        gates = (xt[None, :] @ params["w_ih"].T + params["b_ih"]
                 + h @ params["w_hh"].T + params["b_hh"])
        i = jax.nn.sigmoid(gates[:, 0 * H:1 * H])
        f = jax.nn.sigmoid(gates[:, 1 * H:2 * H])
        g = jnp.tanh(gates[:, 2 * H:3 * H])
        o = jax.nn.sigmoid(gates[:, 3 * H:4 * H])
        c = f * c + i * g
        h = o * jnp.tanh(c)
        return (h, c), h[0]

    (h, c), outs = lax.scan(step, (h, c), x)
    y = outs[-1] @ params["fc_w"].T + params["fc_b"]
    return y, (h, c)


def init_params(key, input_size, hidden_size, output_size):
    ks = jax.random.split(key, 6)
    s = 1.0 / jnp.sqrt(hidden_size)
    return {
        "w_ih": jax.random.uniform(ks[0], (4 * hidden_size, input_size),
                                   jnp.float32, -s, s),
        "w_hh": jax.random.uniform(ks[1], (4 * hidden_size, hidden_size),
                                   jnp.float32, -s, s),
        "b_ih": jax.random.uniform(ks[2], (4 * hidden_size,), jnp.float32, -s, s),
        "b_hh": jax.random.uniform(ks[3], (4 * hidden_size,), jnp.float32, -s, s),
        "fc_w": jax.random.uniform(ks[4], (output_size, hidden_size),
                                   jnp.float32, -s, s),
        "fc_b": jax.random.uniform(ks[5], (output_size,), jnp.float32, -s, s),
    }


if __name__ == "__main__":
    L, input_size, hidden_size, output_size = 8, 16, 32, 4

    key = jax.random.PRNGKey(0)
    k_x, k_p = jax.random.split(key)
    x = jax.random.normal(k_x, (L, input_size), jnp.float32)
    params = init_params(k_p, input_size, hidden_size, output_size)

    # init_hidden(): zeros of shape (num_layers=1, hidden_size)
    h0 = jnp.zeros((1, hidden_size), jnp.float32)
    c0 = jnp.zeros((1, hidden_size), jnp.float32)

    y, (hn, cn) = rnn_model_forward(x, params, (h0, c0))
    jax.block_until_ready((y, hn, cn))

    y_ref, (hn_ref, cn_ref) = rnn_model_forward_ref(x, params, (h0, c0))
    assert y.shape == (output_size,) and hn.shape == (1, hidden_size)
    assert jnp.allclose(y, y_ref, atol=1e-5), "fc output mismatch"
    assert jnp.allclose(hn, hn_ref, atol=1e-5), "h_n mismatch"
    assert jnp.allclose(cn, cn_ref, atol=1e-5), "c_n mismatch"

    print("KERNEL_OK")
</pallas_src>

<mosaic_0001>
module attributes {stable_mosaic.version = 11 : i64} {
  func.func @lstm_fc_kernel(%arg0: memref<8x16xf32, #tpu.memory_space<vmem>>, %arg1: memref<16x128xf32, #tpu.memory_space<vmem>>, %arg2: memref<32x128xf32, #tpu.memory_space<vmem>>, %arg3: memref<1x128xf32, #tpu.memory_space<vmem>>, %arg4: memref<32x4xf32, #tpu.memory_space<vmem>>, %arg5: memref<1x4xf32, #tpu.memory_space<vmem>>, %arg6: memref<1x32xf32, #tpu.memory_space<vmem>>, %arg7: memref<1x32xf32, #tpu.memory_space<vmem>>, %arg8: memref<1x4xf32, #tpu.memory_space<vmem>>, %arg9: memref<1x32xf32, #tpu.memory_space<vmem>>, %arg10: memref<1x32xf32, #tpu.memory_space<vmem>>) attributes {dimension_semantics = [], scalar_prefetch = 0 : i64, scratch_operands = 0 : i64, tpu.core_type = #tpu.core_type<tc>} {
    %c0 = arith.constant 0 : index
    %c0_0 = arith.constant 0 : index
    %0 = vector.load %arg0[%c0, %c0_0] : memref<8x16xf32, #tpu.memory_space<vmem>>, vector<8x16xf32>
    %c0_1 = arith.constant 0 : index
    %c0_2 = arith.constant 0 : index
    %1 = vector.load %arg1[%c0_1, %c0_2] : memref<16x128xf32, #tpu.memory_space<vmem>>, vector<16x128xf32>
    %cst = arith.constant dense<0.000000e+00> : vector<8x128xf32>
    %2 = tpu.matmul %0, %1, %cst {dimension_numbers = #tpu.dot_dimension_numbers<[1], [0], [0], [1], [0, 0, 1, 1], [], []>} : vector<8x16xf32>, vector<16x128xf32>, vector<8x128xf32> -> vector<8x128xf32>
    %c0_3 = arith.constant 0 : index
    %c0_4 = arith.constant 0 : index
    %3 = vector.load %arg3[%c0_3, %c0_4] : memref<1x128xf32, #tpu.memory_space<vmem>>, vector<1x128xf32>
    %4 = vector.broadcast %3 : vector<1x128xf32> to vector<8x128xf32>
    %5 = arith.addf %2, %4 : vector<8x128xf32>
    %c0_5 = arith.constant 0 : index
    %c0_6 = arith.constant 0 : index
    %6 = vector.load %arg2[%c0_5, %c0_6] : memref<32x128xf32, #tpu.memory_space<vmem>>, vector<32x128xf32>
    %c0_7 = arith.constant 0 : index
    %c0_8 = arith.constant 0 : index
    %7 = vector.load %arg6[%c0_7, %c0_8] : memref<1x32xf32, #tpu.memory_space<vmem>>, vector<1x32xf32>
    %c0_9 = arith.constant 0 : index
    %c0_10 = arith.constant 0 : index
    %8 = vector.load %arg7[%c0_9, %c0_10] : memref<1x32xf32, #tpu.memory_space<vmem>>, vector<1x32xf32>
    %9 = vector.extract_strided_slice %5 {offsets = [0, 0], sizes = [1, 128], strides = [1, 1]} : vector<8x128xf32> to vector<1x128xf32>
    %cst_11 = arith.constant dense<0.000000e+00> : vector<1x128xf32>
    %10 = tpu.matmul %7, %6, %cst_11 {dimension_numbers = #tpu.dot_dimension_numbers<[1], [0], [0], [1], [0, 0, 1, 1], [], []>} : vector<1x32xf32>, vector<32x128xf32>, vector<1x128xf32> -> vector<1x128xf32>
    %11 = arith.addf %9, %10 : vector<1x128xf32>
    %12 = arith.negf %11 : vector<1x128xf32>
    %13 = math.exp %12 : vector<1x128xf32>
    %cst_12 = arith.constant 1.000000e+00 : f32
    %14 = vector.broadcast %cst_12 : f32 to vector<1x128xf32>
    %15 = arith.addf %14, %13 : vector<1x128xf32>
    %16 = arith.divf %14, %15 : vector<1x128xf32>
    %17 = math.tanh %11 : vector<1x128xf32>
    %18 = vector.extract_strided_slice %16 {offsets = [0, 0], sizes = [1, 32], strides = [1, 1]} : vector<1x128xf32> to vector<1x32xf32>
    %19 = vector.extract_strided_slice %16 {offsets = [0, 32], sizes = [1, 32], strides = [1, 1]} : vector<1x128xf32> to vector<1x32xf32>
    %20 = vector.extract_strided_slice %16 {offsets = [0, 96], sizes = [1, 32], strides = [1, 1]} : vector<1x128xf32> to vector<1x32xf32>
    %21 = vector.extract_strided_slice %17 {offsets = [0, 64], sizes = [1, 32], strides = [1, 1]} : vector<1x128xf32> to vector<1x32xf32>
    %22 = arith.mulf %19, %8 : vector<1x32xf32>
    %23 = arith.mulf %18, %21 : vector<1x32xf32>
    %24 = arith.addf %22, %23 : vector<1x32xf32>
    %25 = math.tanh %24 : vector<1x32xf32>
    %26 = arith.mulf %20, %25 : vector<1x32xf32>
    %27 = vector.extract_strided_slice %5 {offsets = [1, 0], sizes = [1, 128], strides = [1, 1]} : vector<8x128xf32> to vector<1x128xf32>
    %cst_13 = arith.constant dense<0.000000e+00> : vector<1x128xf32>
    %28 = tpu.matmul %26, %6, %cst_13 {dimension_numbers = #tpu.dot_dimension_numbers<[1], [0], [0], [1], [0, 0, 1, 1], [], []>} : vector<1x32xf32>, vector<32x128xf32>, vector<1x128xf32> -> vector<1x128xf32>
    %29 = arith.addf %27, %28 : vector<1x128xf32>
    %30 = arith.negf %29 : vector<1x128xf32>
    %31 = math.exp %30 : vector<1x128xf32>
    %cst_14 = arith.constant 1.000000e+00 : f32
    %32 = vector.broadcast %cst_14 : f32 to vector<1x128xf32>
    %33 = arith.addf %32, %31 : vector<1x128xf32>
    %34 = arith.divf %32, %33 : vector<1x128xf32>
    %35 = math.tanh %29 : vector<1x128xf32>
    %36 = vector.extract_strided_slice %34 {offsets = [0, 0], sizes = [1, 32], strides = [1, 1]} : vector<1x128xf32> to vector<1x32xf32>
    %37 = vector.extract_strided_slice %34 {offsets = [0, 32], sizes = [1, 32], strides = [1, 1]} : vector<1x128xf32> to vector<1x32xf32>
    %38 = vector.extract_strided_slice %34 {offsets = [0, 96], sizes = [1, 32], strides = [1, 1]} : vector<1x128xf32> to vector<1x32xf32>
    %39 = vector.extract_strided_slice %35 {offsets = [0, 64], sizes = [1, 32], strides = [1, 1]} : vector<1x128xf32> to vector<1x32xf32>
    %40 = arith.mulf %37, %24 : vector<1x32xf32>
    %41 = arith.mulf %36, %39 : vector<1x32xf32>
    %42 = arith.addf %40, %41 : vector<1x32xf32>
    %43 = math.tanh %42 : vector<1x32xf32>
    %44 = arith.mulf %38, %43 : vector<1x32xf32>
    %45 = vector.extract_strided_slice %5 {offsets = [2, 0], sizes = [1, 128], strides = [1, 1]} : vector<8x128xf32> to vector<1x128xf32>
    %cst_15 = arith.constant dense<0.000000e+00> : vector<1x128xf32>
    %46 = tpu.matmul %44, %6, %cst_15 {dimension_numbers = #tpu.dot_dimension_numbers<[1], [0], [0], [1], [0, 0, 1, 1], [], []>} : vector<1x32xf32>, vector<32x128xf32>, vector<1x128xf32> -> vector<1x128xf32>
    %47 = arith.addf %45, %46 : vector<1x128xf32>
    %48 = arith.negf %47 : vector<1x128xf32>
    %49 = math.exp %48 : vector<1x128xf32>
    %cst_16 = arith.constant 1.000000e+00 : f32
    %50 = vector.broadcast %cst_16 : f32 to vector<1x128xf32>
    %51 = arith.addf %50, %49 : vector<1x128xf32>
    %52 = arith.divf %50, %51 : vector<1x128xf32>
    %53 = math.tanh %47 : vector<1x128xf32>
    %54 = vector.extract_strided_slice %52 {offsets = [0, 0], sizes = [1, 32], strides = [1, 1]} : vector<1x128xf32> to vector<1x32xf32>
    %55 = vector.extract_strided_slice %52 {offsets = [0, 32], sizes = [1, 32], strides = [1, 1]} : vector<1x128xf32> to vector<1x32xf32>
    %56 = vector.extract_strided_slice %52 {offsets = [0, 96], sizes = [1, 32], strides = [1, 1]} : vector<1x128xf32> to vector<1x32xf32>
    %57 = vector.extract_strided_slice %53 {offsets = [0, 64], sizes = [1, 32], strides = [1, 1]} : vector<1x128xf32> to vector<1x32xf32>
    %58 = arith.mulf %55, %42 : vector<1x32xf32>
    %59 = arith.mulf %54, %57 : vector<1x32xf32>
    %60 = arith.addf %58, %59 : vector<1x32xf32>
    %61 = math.tanh %60 : vector<1x32xf32>
    %62 = arith.mulf %56, %61 : vector<1x32xf32>
    %63 = vector.extract_strided_slice %5 {offsets = [3, 0], sizes = [1, 128], strides = [1, 1]} : vector<8x128xf32> to vector<1x128xf32>
    %cst_17 = arith.constant dense<0.000000e+00> : vector<1x128xf32>
    %64 = tpu.matmul %62, %6, %cst_17 {dimension_numbers = #tpu.dot_dimension_numbers<[1], [0], [0], [1], [0, 0, 1, 1], [], []>} : vector<1x32xf32>, vector<32x128xf32>, vector<1x128xf32> -> vector<1x128xf32>
    %65 = arith.addf %63, %64 : vector<1x128xf32>
    %66 = arith.negf %65 : vector<1x128xf32>
    %67 = math.exp %66 : vector<1x128xf32>
    %cst_18 = arith.constant 1.000000e+00 : f32
    %68 = vector.broadcast %cst_18 : f32 to vector<1x128xf32>
    %69 = arith.addf %68, %67 : vector<1x128xf32>
    %70 = arith.divf %68, %69 : vector<1x128xf32>
    %71 = math.tanh %65 : vector<1x128xf32>
    %72 = vector.extract_strided_slice %70 {offsets = [0, 0], sizes = [1, 32], strides = [1, 1]} : vector<1x128xf32> to vector<1x32xf32>
    %73 = vector.extract_strided_slice %70 {offsets = [0, 32], sizes = [1, 32], strides = [1, 1]} : vector<1x128xf32> to vector<1x32xf32>
    %74 = vector.extract_strided_slice %70 {offsets = [0, 96], sizes = [1, 32], strides = [1, 1]} : vector<1x128xf32> to vector<1x32xf32>
    %75 = vector.extract_strided_slice %71 {offsets = [0, 64], sizes = [1, 32], strides = [1, 1]} : vector<1x128xf32> to vector<1x32xf32>
    %76 = arith.mulf %73, %60 : vector<1x32xf32>
    %77 = arith.mulf %72, %75 : vector<1x32xf32>
    %78 = arith.addf %76, %77 : vector<1x32xf32>
    %79 = math.tanh %78 : vector<1x32xf32>
    %80 = arith.mulf %74, %79 : vector<1x32xf32>
    %81 = vector.extract_strided_slice %5 {offsets = [4, 0], sizes = [1, 128], strides = [1, 1]} : vector<8x128xf32> to vector<1x128xf32>
    %cst_19 = arith.constant dense<0.000000e+00> : vector<1x128xf32>
    %82 = tpu.matmul %80, %6, %cst_19 {dimension_numbers = #tpu.dot_dimension_numbers<[1], [0], [0], [1], [0, 0, 1, 1], [], []>} : vector<1x32xf32>, vector<32x128xf32>, vector<1x128xf32> -> vector<1x128xf32>
    %83 = arith.addf %81, %82 : vector<1x128xf32>
    %84 = arith.negf %83 : vector<1x128xf32>
    %85 = math.exp %84 : vector<1x128xf32>
    %cst_20 = arith.constant 1.000000e+00 : f32
    %86 = vector.broadcast %cst_20 : f32 to vector<1x128xf32>
    %87 = arith.addf %86, %85 : vector<1x128xf32>
    %88 = arith.divf %86, %87 : vector<1x128xf32>
    %89 = math.tanh %83 : vector<1x128xf32>
    %90 = vector.extract_strided_slice %88 {offsets = [0, 0], sizes = [1, 32], strides = [1, 1]} : vector<1x128xf32> to vector<1x32xf32>
    %91 = vector.extract_strided_slice %88 {offsets = [0, 32], sizes = [1, 32], strides = [1, 1]} : vector<1x128xf32> to vector<1x32xf32>
    %92 = vector.extract_strided_slice %88 {offsets = [0, 96], sizes = [1, 32], strides = [1, 1]} : vector<1x128xf32> to vector<1x32xf32>
    %93 = vector.extract_strided_slice %89 {offsets = [0, 64], sizes = [1, 32], strides = [1, 1]} : vector<1x128xf32> to vector<1x32xf32>
    %94 = arith.mulf %91, %78 : vector<1x32xf32>
    %95 = arith.mulf %90, %93 : vector<1x32xf32>
    %96 = arith.addf %94, %95 : vector<1x32xf32>
    %97 = math.tanh %96 : vector<1x32xf32>
    %98 = arith.mulf %92, %97 : vector<1x32xf32>
    %99 = vector.extract_strided_slice %5 {offsets = [5, 0], sizes = [1, 128], strides = [1, 1]} : vector<8x128xf32> to vector<1x128xf32>
    %cst_21 = arith.constant dense<0.000000e+00> : vector<1x128xf32>
    %100 = tpu.matmul %98, %6, %cst_21 {dimension_numbers = #tpu.dot_dimension_numbers<[1], [0], [0], [1], [0, 0, 1, 1], [], []>} : vector<1x32xf32>, vector<32x128xf32>, vector<1x128xf32> -> vector<1x128xf32>
    %101 = arith.addf %99, %100 : vector<1x128xf32>
    %102 = arith.negf %101 : vector<1x128xf32>
    %103 = math.exp %102 : vector<1x128xf32>
    %cst_22 = arith.constant 1.000000e+00 : f32
    %104 = vector.broadcast %cst_22 : f32 to vector<1x128xf32>
    %105 = arith.addf %104, %103 : vector<1x128xf32>
    %106 = arith.divf %104, %105 : vector<1x128xf32>
    %107 = math.tanh %101 : vector<1x128xf32>
    %108 = vector.extract_strided_slice %106 {offsets = [0, 0], sizes = [1, 32], strides = [1, 1]} : vector<1x128xf32> to vector<1x32xf32>
    %109 = vector.extract_strided_slice %106 {offsets = [0, 32], sizes = [1, 32], strides = [1, 1]} : vector<1x128xf32> to vector<1x32xf32>
    %110 = vector.extract_strided_slice %106 {offsets = [0, 96], sizes = [1, 32], strides = [1, 1]} : vector<1x128xf32> to vector<1x32xf32>
    %111 = vector.extract_strided_slice %107 {offsets = [0, 64], sizes = [1, 32], strides = [1, 1]} : vector<1x128xf32> to vector<1x32xf32>
    %112 = arith.mulf %109, %96 : vector<1x32xf32>
    %113 = arith.mulf %108, %111 : vector<1x32xf32>
    %114 = arith.addf %112, %113 : vector<1x32xf32>
    %115 = math.tanh %114 : vector<1x32xf32>
    %116 = arith.mulf %110, %115 : vector<1x32xf32>
    %117 = vector.extract_strided_slice %5 {offsets = [6, 0], sizes = [1, 128], strides = [1, 1]} : vector<8x128xf32> to vector<1x128xf32>
    %cst_23 = arith.constant dense<0.000000e+00> : vector<1x128xf32>
    %118 = tpu.matmul %116, %6, %cst_23 {dimension_numbers = #tpu.dot_dimension_numbers<[1], [0], [0], [1], [0, 0, 1, 1], [], []>} : vector<1x32xf32>, vector<32x128xf32>, vector<1x128xf32> -> vector<1x128xf32>
    %119 = arith.addf %117, %118 : vector<1x128xf32>
    %120 = arith.negf %119 : vector<1x128xf32>
    %121 = math.exp %120 : vector<1x128xf32>
    %cst_24 = arith.constant 1.000000e+00 : f32
    %122 = vector.broadcast %cst_24 : f32 to vector<1x128xf32>
    %123 = arith.addf %122, %121 : vector<1x128xf32>
    %124 = arith.divf %122, %123 : vector<1x128xf32>
    %125 = math.tanh %119 : vector<1x128xf32>
    %126 = vector.extract_strided_slice %124 {offsets = [0, 0], sizes = [1, 32], strides = [1, 1]} : vector<1x128xf32> to vector<1x32xf32>
    %127 = vector.extract_strided_slice %124 {offsets = [0, 32], sizes = [1, 32], strides = [1, 1]} : vector<1x128xf32> to vector<1x32xf32>
    %128 = vector.extract_strided_slice %124 {offsets = [0, 96], sizes = [1, 32], strides = [1, 1]} : vector<1x128xf32> to vector<1x32xf32>
    %129 = vector.extract_strided_slice %125 {offsets = [0, 64], sizes = [1, 32], strides = [1, 1]} : vector<1x128xf32> to vector<1x32xf32>
    %130 = arith.mulf %127, %114 : vector<1x32xf32>
    %131 = arith.mulf %126, %129 : vector<1x32xf32>
    %132 = arith.addf %130, %131 : vector<1x32xf32>
    %133 = math.tanh %132 : vector<1x32xf32>
    %134 = arith.mulf %128, %133 : vector<1x32xf32>
    %135 = vector.extract_strided_slice %5 {offsets = [7, 0], sizes = [1, 128], strides = [1, 1]} : vector<8x128xf32> to vector<1x128xf32>
    %cst_25 = arith.constant dense<0.000000e+00> : vector<1x128xf32>
    %136 = tpu.matmul %134, %6, %cst_25 {dimension_numbers = #tpu.dot_dimension_numbers<[1], [0], [0], [1], [0, 0, 1, 1], [], []>} : vector<1x32xf32>, vector<32x128xf32>, vector<1x128xf32> -> vector<1x128xf32>
    %137 = arith.addf %135, %136 : vector<1x128xf32>
    %138 = arith.negf %137 : vector<1x128xf32>
    %139 = math.exp %138 : vector<1x128xf32>
    %cst_26 = arith.constant 1.000000e+00 : f32
    %140 = vector.broadcast %cst_26 : f32 to vector<1x128xf32>
    %141 = arith.addf %140, %139 : vector<1x128xf32>
    %142 = arith.divf %140, %141 : vector<1x128xf32>
    %143 = math.tanh %137 : vector<1x128xf32>
    %144 = vector.extract_strided_slice %142 {offsets = [0, 0], sizes = [1, 32], strides = [1, 1]} : vector<1x128xf32> to vector<1x32xf32>
    %145 = vector.extract_strided_slice %142 {offsets = [0, 32], sizes = [1, 32], strides = [1, 1]} : vector<1x128xf32> to vector<1x32xf32>
    %146 = vector.extract_strided_slice %142 {offsets = [0, 96], sizes = [1, 32], strides = [1, 1]} : vector<1x128xf32> to vector<1x32xf32>
    %147 = vector.extract_strided_slice %143 {offsets = [0, 64], sizes = [1, 32], strides = [1, 1]} : vector<1x128xf32> to vector<1x32xf32>
    %148 = arith.mulf %145, %132 : vector<1x32xf32>
    %149 = arith.mulf %144, %147 : vector<1x32xf32>
    %150 = arith.addf %148, %149 : vector<1x32xf32>
    %151 = math.tanh %150 : vector<1x32xf32>
    %152 = arith.mulf %146, %151 : vector<1x32xf32>
    %c0_27 = arith.constant 0 : index
    %c0_28 = arith.constant 0 : index
    %153 = vector.load %arg9[%c0_27, %c0_28] : memref<1x32xf32, #tpu.memory_space<vmem>>, vector<1x32xf32>
    tpu.vector_store %arg9[%c0_27, %c0_28], %152 {strides = array<i32>} : memref<1x32xf32, #tpu.memory_space<vmem>>, vector<1x32xf32>,
    %c0_29 = arith.constant 0 : index
    %c0_30 = arith.constant 0 : index
    %154 = vector.load %arg10[%c0_29, %c0_30] : memref<1x32xf32, #tpu.memory_space<vmem>>, vector<1x32xf32>
    tpu.vector_store %arg10[%c0_29, %c0_30], %150 {strides = array<i32>} : memref<1x32xf32, #tpu.memory_space<vmem>>, vector<1x32xf32>,
    %c0_31 = arith.constant 0 : index
    %c0_32 = arith.constant 0 : index
    %155 = vector.load %arg4[%c0_31, %c0_32] : memref<32x4xf32, #tpu.memory_space<vmem>>, vector<32x4xf32>
    %cst_33 = arith.constant dense<0.000000e+00> : vector<1x4xf32>
    %156 = tpu.matmul %152, %155, %cst_33 {dimension_numbers = #tpu.dot_dimension_numbers<[1], [0], [0], [1], [0, 0, 1, 1], [], []>} : vector<1x32xf32>, vector<32x4xf32>, vector<1x4xf32> -> vector<1x4xf32>
    %c0_34 = arith.constant 0 : index
    %c0_35 = arith.constant 0 : index
    %157 = vector.load %arg5[%c0_34, %c0_35] : memref<1x4xf32, #tpu.memory_space<vmem>>, vector<1x4xf32>
    %158 = arith.addf %156, %157 : vector<1x4xf32>
    %c0_36 = arith.constant 0 : index
    %c0_37 = arith.constant 0 : index
    %159 = vector.load %arg8[%c0_36, %c0_37] : memref<1x4xf32, #tpu.memory_space<vmem>>, vector<1x4xf32>
    tpu.vector_store %arg8[%c0_36, %c0_37], %158 {strides = array<i32>} : memref<1x4xf32, #tpu.memory_space<vmem>>, vector<1x4xf32>,
    return
  }
}

</mosaic_0001>

<bundles_post_ra>
// kernel: tpu_custom_call.1
= control target key start
LH: loop header
LB: loop body
LE: loop exit
PB: predicated region body
PF: predicated region fallthrough
CT: control target
= control target key end

     0   :  { %16 = vsyncpa [#allocation3], 0  ;;  %s1795_s0 = inlined_call_operand.vmem [shape: f32[8,16], index: 0, kind: input, shape index: {}]   ;;  %s1796_s1 = inlined_call_operand.hbm [shape: f32[16,128], index: 1, kind: input, shape index: {}]   ;;  %s1797_s2 = inlined_call_operand.vmem [shape: f32[32,128], index: 2, kind: input, shape index: {}]   ;;  %s1798_s3 = inlined_call_operand.vmem [shape: f32[1,128], index: 3, kind: input, shape index: {}]   ;;  %s1799_s4 = inlined_call_operand.vmem [shape: f32[32,4], index: 4, kind: input, shape index: {}]   ;;  %s1800_s5 = inlined_call_operand.vmem [shape: f32[1,4], index: 5, kind: input, shape index: {}]   ;;  %s1801_s6 = inlined_call_operand.vmem [shape: f32[1,32], index: 6, kind: input, shape index: {}]   ;;  %s1802_s7 = inlined_call_operand.vmem [shape: f32[1,32], index: 7, kind: input, shape index: {}]   ;;  %s1803_s8 = inlined_call_operand.hbm [shape: f32[1,4], index: 8, kind: output, shape index: {0}]   ;;  %s1804_s9 = inlined_call_operand.hbm [shape: f32[1,32], index: 9, kind: output, shape index: {1}]   ;;  %s1805_s10 = inlined_call_operand.hbm [shape: f32[1,32], index: 10, kind: output, shape index: {2}]  }
   0x1   :  { %17 = vsyncpa [#allocation4], 0 }
   0x2   :  { %18 = vsyncpa [#allocation7], 0  ;;  %s1529_s13 = smov [#allocation2]   ;;  %s1435_s17 = scalar_lea.hbm %s1796_s1, 256 }
   0x3   :  { %s26_s14 = sshll.u32 %s1529_s13, 4  ;;  %p1436_p0 = scmp.ne.s32.totalorder %s1796_s1, %s1435_s17  ;;  %s27_s14 = int_to_ptr.vmem [resolvable:$true] %s26_s14 }
   0x4   :  { %p1439_p1 = scmp.lt.u32.totalorder %s1435_s17, %s1796_s1 }
   0x6   :  { %p1441_p2 = pnand %p1439_p1, %p1436_p0 }
   0x8   :  { %1444 = shalt.err (!%p1441_p2)
}
   0x9   :  { %s1445_s22 = scalar_lea.vmem %s27_s14, 256  ;;  %p1450_p4 = scmp.lt.s32.totalorder %s27_s14, %s27_s14 }
   0xa   :  { %p1446_p3 = scmp.ne.s32.totalorder %s27_s14, %s1445_s22  ;;  %p1451_p5 = scmp.lt.s32.totalorder %s1445_s22, %s1445_s22 }
   0xc   :  { %p1452_p6 = por %p1451_p5, %p1450_p4 }
   0xe   :  { %p1453_p7 = pnand %p1452_p6, %p1446_p3 }
  0x10   :  { %1456 = shalt.err (!%p1453_p7)
}
  0x11   :  { %s1530_s23 = smov 128   ;;  %s1531_s24 = smov 8  }
  0x12   :  { %32 = dma.hbm_to_vmem [thread:$0]  %s1796_s1, 256, %s27_s14, [#allocation3], %s1530_s23, %s1530_s23, %s1531_s24  }
  0x13   :  { %1523 = dma.done.wait [#allocation3], 256  }
  0x14   :  { %1524 = vsyncadd [#allocation3], 4294967040  ;;  %v1532_v0 = vmov 0.0|0.0   ;;  %vm1533_vm0 = vmmov 0   ;;  %v1534_v1 = vmov 0.0   ;;  %v132_v2 = vld [vmem:[%s1797_s2] sm:$0xff] }
  0x15   :  { %1305 = vmatprep.subr.bf16.mxu1 %v1532_v0  ;;  %1302 = vmatprep.subr.bf16.mxu0 %v1532_v0  ;;  %v133_v3 = vld [vmem:[%s1797_s2 + $0x8] sm:$0xff]  ;;  %v49_v4 = vld [vmem:[#allocation2] sm:$0xff]  ;;  %v134_v7 = vld [vmem:[%s1797_s2 + $0x10] sm:$0xff]  ;;  %vm58_vm1 = vcmask 130048   ;;  %vm138_vm2 = vcmask 261120   ;;  %s1536_s20 = smov 32  }
  0x16   :  { %1200 = vmatprep.mubr.msk.f32.mxu0 %vm1533_vm0, %v1534_v1  ;;  %1211 = vmatprep.mubr.msk.f32.mxu1 %vm1533_vm0, %v1534_v1  ;;  %v1620_v5 = vpack.c.bf16 %v133_v3, %v132_v2  ;;  %v50_v6 = vld [vmem:[#allocation2 + $0x8] sm:$0xff]  ;;  %v135_v9 = vld [vmem:[%s1797_s2 + $0x18] sm:$0xff]  ;;  %v48_v11 = vld [vmem:[%s1795_s0] sm:$0xff]  ;;  %s1537_s27 = smov 96   ;;  %vm997_vm3 = vcmask 261127  }
  0x17   :  { %v1303_v8 = vpack.c.bf16 %v50_v6, %v49_v4  ;;  %v1629_v10 = vpack.c.bf16 %v135_v9, %v134_v7  ;;  %v136_v12 = vld [vmem:[%s1801_s6] sm:$0x1]  ;;  %s1535_s6 = smov 64  }
  0x18   :  { %1307 = vmatpush3.bf16.msra.mxu1 %v1620_v5  ;;  %v1128_v13 = vld [vmem:[%s1798_s3] ss:$0 sm:$0xff] }
  0x19   :  { %1304 = vmatpush3.bf16.msra.mxu0 %v1303_v8  ;;  %1308 = vmatprep.subr.bf16.mxu1 %v1532_v0  ;;  %v1132_v21 = vld [vmem:[%s1802_s7] ss:$0 sm:$0xff] }
  0x1a   :  { %1311 = vmatprep.subr.bf16.mxu0 %v1532_v0 }
  0x1c   :  { %1201 = vmatmul.mubr.msk.f32.vlgmr.msra.gmra.mrb[0].mxu0 %vm58_vm1, %v48_v11  ;;  %1310 = vmatpush3.bf16.msra.mxu1 %v1629_v10 }
  0x1d   :  { %1313 = vmatpush3.bf16.msra.mxu0 %v1620_v5  ;;  %1222 = vmatprep.mubr.msk.f32.mxu0 %vm1533_vm0, %v1534_v1 }
  0x1e   :  { %1314 = vmatprep.subr.bf16.mxu0 %v1532_v0  ;;  %1317 = vmatprep.subr.bf16.mxu1 %v1532_v0 }
  0x1f   :  { %1212 = vmatmul.mubr.msk.f32.vlgmr.msra.gmra.mrb[0].mxu1 %vm138_vm2, %v136_v12 }
  0x20   :  { %1319 = vmatpush3.bf16.msra.mxu1 %v1620_v5  ;;  %1233 = vmatprep.mubr.msk.f32.mxu1 %vm1533_vm0, %v1534_v1 }
  0x21   :  { %1316 = vmatpush3.bf16.msra.mxu0 %v1629_v10  ;;  %1320 = vmatprep.subr.bf16.mxu1 %v1532_v0 }
  0x22   :  { %1323 = vmatprep.subr.bf16.mxu0 %v1532_v0 }
  0x24   :  { %1322 = vmatpush3.bf16.msra.mxu1 %v1629_v10 }
  0x25   :  { %1329 = vmatprep.subr.bf16.mxu1 %v1532_v0 }
  0xef   :  { %v128_v14 = vpop.f32.mrb[0].mxu0 }
  0xf0   :  { %v1657_v15 = vadd.f32 %v1128_v13, %v128_v14  ;;  %v1202_v16 = vpop.f32.mrb[1].mxu0 }
  0xf2   :  { %v208_v17 = vpop.f32.mrb[0].mxu1 }
  0xf3   :  { %v212_v18 = vadd.f32 %v208_v17, %v1657_v15  ;;  %v1213_v19 = vpop.f32.mrb[1].mxu1 }
  0xf5   :  { %1371 = vtanh.f32 %v212_v18  ;;  %v1131_v22 = vmul.f32 -1.442695, %v212_v18 }
  0xf7   :  { %1373 = vpow2.f32 %v1131_v22 }
  0xff   :  { %v1372_v20 = vpop.eup %1371 }
 0x100   :  { %230 = vrot.lane.b32.xlu0 %v1372_v20, %s1535_s6 }
 0x101   :  { %v1374_v23 = vpop.eup %1373 }
 0x102   :  { %v216_v24 = vadd.f32 1.0, %v1374_v23 }
 0x104   :  { %225 = vrot.lane.b32.xlu0 %v1132_v21, %s1536_s20  ;;  %1375 = vrcp.f32 %v216_v24 }
 0x10e   :  { %v1376_v25 = vpop.eup %1375 }
 0x172   :  { %v231_v26 = vpop.permute.xlu0 %230 }
 0x173   :  { %v233_v27 = vmul.f32 %v1376_v25, %v231_v26 }
 0x175   :  { %235 = vrot.lane.b32.xlu1 %v233_v27, %s1536_s20 }
 0x176   :  { %v226_v28 = vpop.permute.xlu0 %225 }
 0x177   :  { %v228_v29 = vmul.f32 %v1376_v25, %v226_v28 }
 0x1e7   :  { %v236_v30 = vpop.permute.xlu1 %235 }
 0x1e8   :  { %v238_v31 = vadd.f32 %v236_v30, %v228_v29 }
 0x1ea   :  { %1377 = vtanh.f32 %v238_v31  ;;  %v332_v47 = vrot.slane %v238_v31, 7 }
 0x1f4   :  { %v1378_v32 = vpop.eup %1377 }
 0x1f5   :  { %241 = vrot.lane.b32.xlu1 %v1378_v32, %s1535_s6 }
 0x267   :  { %v242_v33 = vpop.permute.xlu1 %241 }
 0x268   :  { %v244_v34 = vmul.f32 %v1376_v25, %v242_v33 }
 0x26a   :  { %246 = vrot.lane.b32.xlu0 %v244_v34, %s1536_s20 }
 0x2dc   :  { %v247_v35 = vpop.permute.xlu0 %246 }
 0x2dd   :  { %1223 = vmatmul.mubr.msk.f32.vlgmr.msra.gmra.mrb[2].mxu0 %vm138_vm2, %v247_v35 }
 0x2de   :  { %1325 = vmatpush3.bf16.msra.mxu0 %v1620_v5  ;;  %1244 = vmatprep.mubr.msk.f32.mxu0 %vm1533_vm0, %v1534_v1 }
 0x2df   :  { %1326 = vmatprep.subr.bf16.mxu0 %v1532_v0 }
 0x2e2   :  { %1328 = vmatpush3.bf16.msra.mxu0 %v1629_v10 }
 0x2e3   :  { %1335 = vmatprep.subr.bf16.mxu0 %v1532_v0 }
 0x3b0   :  { %v316_v36 = vpop.f32.mrb[2].mxu0 }
 0x3b1   :  { %v321_v37 = vrot.slane %v316_v36, 7  ;;  %v1224_v38 = vpop.f32.mrb[3].mxu0 }
 0x3b3   :  { %v323_v39 = vadd.f32 %v321_v37, %v1657_v15 }
 0x3b5   :  { %1379 = vtanh.f32 %v323_v39  ;;  %v1134_v41 = vmul.f32 -1.442695, %v323_v39 }
 0x3b7   :  { %1381 = vpow2.f32 %v1134_v41 }
 0x3bf   :  { %v1380_v40 = vpop.eup %1379 }
 0x3c0   :  { %336 = vrot.lane.b32.xlu1 %v1380_v40, %s1535_s6 }
 0x3c1   :  { %v1382_v42 = vpop.eup %1381 }
 0x3c2   :  { %v327_v43 = vadd.f32 1.0, %v1382_v42 }
 0x3c4   :  { %1383 = vrcp.f32 %v327_v43 }
 0x3ce   :  { %v1384_v44 = vpop.eup %1383 }
 0x3cf   :  { %v334_v48 = vmul.f32 %v1384_v44, %v332_v47 }
 0x432   :  { %v337_v45 = vpop.permute.xlu1 %336 }
 0x433   :  { %v339_v46 = vmul.f32 %v1384_v44, %v337_v45 }
 0x435   :  { %341 = vrot.lane.b32.xlu0 %v339_v46, %s1536_s20 }
 0x4a7   :  { %v342_v49 = vpop.permute.xlu0 %341 }
 0x4a8   :  { %v344_v50 = vadd.f32 %v342_v49, %v334_v48 }
 0x4aa   :  { %1385 = vtanh.f32 %v344_v50  ;;  %v439_v6 = vrot.slane %v344_v50, 7 }
 0x4b4   :  { %v1386_v51 = vpop.eup %1385 }
 0x4b5   :  { %347 = vrot.lane.b32.xlu1 %v1386_v51, %s1535_s6 }
 0x527   :  { %v348_v52 = vpop.permute.xlu1 %347 }
 0x528   :  { %v350_v53 = vmul.f32 %v1384_v44, %v348_v52 }
 0x52a   :  { %v352_v54 = vrot.slane %v350_v53, 1 }
 0x52c   :  { %353 = vrot.lane.b32.xlu0 %v352_v54, %s1536_s20 }
 0x59e   :  { %v354_v55 = vpop.permute.xlu0 %353 }
 0x59f   :  { %1234 = vmatmul.mubr.msk.f32.vlgmr.msra.gmra.mrb[2].mxu1 %vm138_vm2, %v354_v55 }
 0x5a0   :  { %1331 = vmatpush3.bf16.msra.mxu1 %v1620_v5  ;;  %1255 = vmatprep.mubr.msk.f32.mxu1 %vm1533_vm0, %v1534_v1 }
 0x5a1   :  { %1332 = vmatprep.subr.bf16.mxu1 %v1532_v0 }
 0x5a4   :  { %1334 = vmatpush3.bf16.msra.mxu1 %v1629_v10 }
 0x5a5   :  { %1341 = vmatprep.subr.bf16.mxu1 %v1532_v0 }
 0x672   :  { %v423_v56 = vpop.f32.mrb[2].mxu1 }
 0x673   :  { %v428_v57 = vrot.slane %v423_v56, 6  ;;  %v1235_v58 = vpop.f32.mrb[3].mxu1 }
 0x675   :  { %v430_v59 = vadd.f32 %v428_v57, %v1657_v15 }
 0x677   :  { %1387 = vtanh.f32 %v430_v59  ;;  %v1136_v61 = vmul.f32 -1.442695, %v430_v59 }
 0x679   :  { %1389 = vpow2.f32 %v1136_v61 }
 0x681   :  { %v1388_v60 = vpop.eup %1387 }
 0x682   :  { %443 = vrot.lane.b32.xlu1 %v1388_v60, %s1535_s6 }
 0x683   :  { %v1390_v62 = vpop.eup %1389 }
 0x684   :  { %v434_v63 = vadd.f32 1.0, %v1390_v62 }
 0x686   :  { %1391 = vrcp.f32 %v434_v63 }
 0x690   :  { %v1392_v2 = vpop.eup %1391 }
 0x691   :  { %v441_v7 = vmul.f32 %v1392_v2, %v439_v6 }
 0x6f4   :  { %v444_v3 = vpop.permute.xlu1 %443 }
 0x6f5   :  { %v446_v4 = vmul.f32 %v1392_v2, %v444_v3 }
 0x6f7   :  { %448 = vrot.lane.b32.xlu0 %v446_v4, %s1536_s20 }
 0x769   :  { %v449_v8 = vpop.permute.xlu0 %448 }
 0x76a   :  { %v451_v9 = vadd.f32 %v449_v8, %v441_v7 }
 0x76c   :  { %1393 = vtanh.f32 %v451_v9  ;;  %v546_v28 = vrot.slane %v451_v9, 7 }
 0x776   :  { %v1394_v11 = vpop.eup %1393 }
 0x777   :  { %454 = vrot.lane.b32.xlu1 %v1394_v11, %s1535_s6 }
 0x7e9   :  { %v455_v12 = vpop.permute.xlu1 %454 }
 0x7ea   :  { %v457_v13 = vmul.f32 %v1392_v2, %v455_v12 }
 0x7ec   :  { %v459_v14 = vrot.slane %v457_v13, 2 }
 0x7ee   :  { %460 = vrot.lane.b32.xlu0 %v459_v14, %s1536_s20 }
 0x860   :  { %v461_v16 = vpop.permute.xlu0 %460 }
 0x861   :  { %1245 = vmatmul.mubr.msk.f32.vlgmr.msra.gmra.mrb[4].mxu0 %vm138_vm2, %v461_v16 }
 0x862   :  { %1337 = vmatpush3.bf16.msra.mxu0 %v1620_v5  ;;  %1266 = vmatprep.mubr.msk.f32.mxu0 %vm1533_vm0, %v1534_v1 }
 0x863   :  { %1338 = vmatprep.subr.bf16.mxu0 %v1532_v0 }
 0x866   :  { %1340 = vmatpush3.bf16.msra.mxu0 %v1629_v10 }
 0x867   :  { %1347 = vmatprep.subr.bf16.mxu0 %v1532_v0 }
 0x934   :  { %v530_v17 = vpop.f32.mrb[4].mxu0 }
 0x935   :  { %v535_v18 = vrot.slane %v530_v17, 5  ;;  %v1246_v19 = vpop.f32.mrb[5].mxu0 }
 0x937   :  { %v537_v20 = vadd.f32 %v535_v18, %v1657_v15 }
 0x939   :  { %1395 = vtanh.f32 %v537_v20  ;;  %v1138_v22 = vmul.f32 -1.442695, %v537_v20 }
 0x93b   :  { %1397 = vpow2.f32 %v1138_v22 }
 0x943   :  { %v1396_v21 = vpop.eup %1395 }
 0x944   :  { %550 = vrot.lane.b32.xlu1 %v1396_v21, %s1535_s6 }
 0x945   :  { %v1398_v23 = vpop.eup %1397 }
 0x946   :  { %v541_v24 = vadd.f32 1.0, %v1398_v23 }
 0x948   :  { %1399 = vrcp.f32 %v541_v24 }
 0x952   :  { %v1400_v25 = vpop.eup %1399 }
 0x953   :  { %v548_v29 = vmul.f32 %v1400_v25, %v546_v28 }
 0x9b6   :  { %v551_v26 = vpop.permute.xlu1 %550 }
 0x9b7   :  { %v553_v27 = vmul.f32 %v1400_v25, %v551_v26 }
 0x9b9   :  { %555 = vrot.lane.b32.xlu0 %v553_v27, %s1536_s20 }
 0xa2b   :  { %v556_v30 = vpop.permute.xlu0 %555 }
 0xa2c   :  { %v558_v31 = vadd.f32 %v556_v30, %v548_v29 }
 0xa2e   :  { %1401 = vtanh.f32 %v558_v31  ;;  %v653_v48 = vrot.slane %v558_v31, 7 }
 0xa38   :  { %v1402_v32 = vpop.eup %1401 }
 0xa39   :  { %561 = vrot.lane.b32.xlu1 %v1402_v32, %s1535_s6 }
 0xaab   :  { %v562_v33 = vpop.permute.xlu1 %561 }
 0xaac   :  { %v564_v34 = vmul.f32 %v1400_v25, %v562_v33 }
 0xaae   :  { %v566_v35 = vrot.slane %v564_v34, 3 }
 0xab0   :  { %567 = vrot.lane.b32.xlu0 %v566_v35, %s1536_s20 }
 0xb22   :  { %v568_v36 = vpop.permute.xlu0 %567 }
 0xb23   :  { %1256 = vmatmul.mubr.msk.f32.vlgmr.msra.gmra.mrb[4].mxu1 %vm138_vm2, %v568_v36 }
 0xb24   :  { %1343 = vmatpush3.bf16.msra.mxu1 %v1620_v5  ;;  %1277 = vmatprep.mubr.msk.f32.mxu1 %vm1533_vm0, %v1534_v1 }
 0xb25   :  { %1344 = vmatprep.subr.bf16.mxu1 %v1532_v0 }
 0xb28   :  { %1346 = vmatpush3.bf16.msra.mxu1 %v1629_v10 }
 0xb29   :  { %1353 = vmatprep.subr.bf16.mxu1 %v1532_v0 }
 0xbf6   :  { %v637_v37 = vpop.f32.mrb[4].mxu1 }
 0xbf7   :  { %v642_v38 = vrot.slane %v637_v37, 4  ;;  %v1257_v39 = vpop.f32.mrb[5].mxu1 }
 0xbf9   :  { %v644_v40 = vadd.f32 %v642_v38, %v1657_v15 }
 0xbfb   :  { %1403 = vtanh.f32 %v644_v40  ;;  %v1140_v42 = vmul.f32 -1.442695, %v644_v40 }
 0xbfd   :  { %1405 = vpow2.f32 %v1140_v42 }
 0xc05   :  { %v1404_v41 = vpop.eup %1403 }
 0xc06   :  { %657 = vrot.lane.b32.xlu1 %v1404_v41, %s1535_s6 }
 0xc07   :  { %v1406_v43 = vpop.eup %1405 }
 0xc08   :  { %v648_v44 = vadd.f32 1.0, %v1406_v43 }
 0xc0a   :  { %1407 = vrcp.f32 %v648_v44 }
 0xc14   :  { %v1408_v45 = vpop.eup %1407 }
 0xc15   :  { %v655_v49 = vmul.f32 %v1408_v45, %v653_v48 }
 0xc78   :  { %v658_v46 = vpop.permute.xlu1 %657 }
 0xc79   :  { %v660_v47 = vmul.f32 %v1408_v45, %v658_v46 }
 0xc7b   :  { %662 = vrot.lane.b32.xlu0 %v660_v47, %s1536_s20 }
 0xced   :  { %v663_v50 = vpop.permute.xlu0 %662 }
 0xcee   :  { %v665_v51 = vadd.f32 %v663_v50, %v655_v49  ;;  %v1005_v50 = vld [vmem:[%s1799_s4 + $0x8] sm:$0xff] }
 0xcf0   :  { %1409 = vtanh.f32 %v665_v51 }
 0xcfa   :  { %v1410_v52 = vpop.eup %1409 }
 0xcfb   :  { %668 = vrot.lane.b32.xlu1 %v1410_v52, %s1535_s6 }
 0xd6d   :  { %v669_v53 = vpop.permute.xlu1 %668 }
 0xd6e   :  { %v671_v54 = vmul.f32 %v1408_v45, %v669_v53  ;;  %v1007_v53 = vld [vmem:[%s1799_s4 + $0x18] sm:$0xff] }
 0xd70   :  { %v673_v55 = vrot.slane %v671_v54, 4 }
 0xd72   :  { %674 = vrot.lane.b32.xlu0 %v673_v55, %s1536_s20 }
 0xde4   :  { %v675_v56 = vpop.permute.xlu0 %674 }
 0xde5   :  { %1267 = vmatmul.mubr.msk.f32.vlgmr.msra.gmra.mrb[6].mxu0 %vm138_vm2, %v675_v56 }
 0xde6   :  { %1349 = vmatpush3.bf16.msra.mxu0 %v1620_v5  ;;  %1288 = vmatprep.mubr.msk.f32.mxu0 %vm1533_vm0, %v1534_v1 }
 0xde7   :  { %1350 = vmatprep.subr.bf16.mxu0 %v1532_v0 }
 0xdea   :  { %1352 = vmatpush3.bf16.msra.mxu0 %v1629_v10  ;;  %v760_v10 = vrot.slane %v665_v51, 7  ;;  %v1006_v51 = vld [vmem:[%s1799_s4 + $0x10] sm:$0xff] }
 0xdeb   :  { %v1357_v54 = vpack.c.bf16 %v1007_v53, %v1006_v51 }
 0xeb8   :  { %v744_v57 = vpop.f32.mrb[6].mxu0 }
 0xeb9   :  { %v749_v58 = vrot.slane %v744_v57, 3  ;;  %v1268_v59 = vpop.f32.mrb[7].mxu0 }
 0xebb   :  { %v751_v60 = vadd.f32 %v749_v58, %v1657_v15 }
 0xebd   :  { %1411 = vtanh.f32 %v751_v60  ;;  %v1142_v62 = vmul.f32 -1.442695, %v751_v60 }
 0xebf   :  { %1413 = vpow2.f32 %v1142_v62 }
 0xec7   :  { %v1412_v61 = vpop.eup %1411 }
 0xec8   :  { %764 = vrot.lane.b32.xlu1 %v1412_v61, %s1535_s6 }
 0xec9   :  { %v1414_v63 = vpop.eup %1413 }
 0xeca   :  { %v755_v5 = vadd.f32 1.0, %v1414_v63 }
 0xecc   :  { %1415 = vrcp.f32 %v755_v5 }
 0xed6   :  { %v1416_v2 = vpop.eup %1415 }
 0xed7   :  { %v762_v6 = vmul.f32 %v1416_v2, %v760_v10 }
 0xf3a   :  { %v765_v3 = vpop.permute.xlu1 %764 }
 0xf3b   :  { %v767_v4 = vmul.f32 %v1416_v2, %v765_v3 }
 0xf3d   :  { %769 = vrot.lane.b32.xlu0 %v767_v4, %s1536_s20 }
 0xfaf   :  { %v770_v7 = vpop.permute.xlu0 %769 }
 0xfb0   :  { %v772_v8 = vadd.f32 %v770_v7, %v762_v6 }
 0xfb2   :  { %1417 = vtanh.f32 %v772_v8 }
 0xfbc   :  { %v1418_v9 = vpop.eup %1417 }
 0xfbd   :  { %775 = vrot.lane.b32.xlu1 %v1418_v9, %s1535_s6 }
0x102f   :  { %v776_v11 = vpop.permute.xlu1 %775 }
0x1030   :  { %v778_v12 = vmul.f32 %v1416_v2, %v776_v11 }
0x1032   :  { %v780_v13 = vrot.slane %v778_v12, 5 }
0x1034   :  { %781 = vrot.lane.b32.xlu0 %v780_v13, %s1536_s20 }
0x10a6   :  { %v782_v14 = vpop.permute.xlu0 %781 }
0x10a7   :  { %1278 = vmatmul.mubr.msk.f32.vlgmr.msra.gmra.mrb[6].mxu1 %vm138_vm2, %v782_v14 }
0x10a8   :  { %1299 = vmatprep.mubr.msk.f32.mxu1 %vm1533_vm0, %v1534_v1  ;;  %v867_v1 = vrot.slane %v772_v8, 7 }
0x117a   :  { %v851_v16 = vpop.f32.mrb[6].mxu1 }
0x117b   :  { %v856_v17 = vrot.slane %v851_v16, 2  ;;  %v1279_v18 = vpop.f32.mrb[7].mxu1 }
0x117d   :  { %v858_v19 = vadd.f32 %v856_v17, %v1657_v15 }
0x117f   :  { %1419 = vtanh.f32 %v858_v19  ;;  %v1144_v21 = vmul.f32 -1.442695, %v858_v19 }
0x1181   :  { %1421 = vpow2.f32 %v1144_v21 }
0x1189   :  { %v1420_v20 = vpop.eup %1419 }
0x118a   :  { %871 = vrot.lane.b32.xlu1 %v1420_v20, %s1535_s6 }
0x118b   :  { %v1422_v22 = vpop.eup %1421 }
0x118c   :  { %v862_v23 = vadd.f32 1.0, %v1422_v22 }
0x118e   :  { %1423 = vrcp.f32 %v862_v23 }
0x1198   :  { %v1424_v24 = vpop.eup %1423 }
0x1199   :  { %v869_v27 = vmul.f32 %v1424_v24, %v867_v1 }
0x11fc   :  { %v872_v25 = vpop.permute.xlu1 %871 }
0x11fd   :  { %v874_v26 = vmul.f32 %v1424_v24, %v872_v25 }
0x11ff   :  { %876 = vrot.lane.b32.xlu0 %v874_v26, %s1536_s20 }
0x1271   :  { %v877_v28 = vpop.permute.xlu0 %876 }
0x1272   :  { %v879_v29 = vadd.f32 %v877_v28, %v869_v27 }
0x1274   :  { %1425 = vtanh.f32 %v879_v29  ;;  %v974_v46 = vrot.slane %v879_v29, 7 }
0x127e   :  { %v1426_v30 = vpop.eup %1425 }
0x127f   :  { %882 = vrot.lane.b32.xlu1 %v1426_v30, %s1535_s6 }
0x12f1   :  { %v883_v31 = vpop.permute.xlu1 %882 }
0x12f2   :  { %v885_v32 = vmul.f32 %v1424_v24, %v883_v31 }
0x12f4   :  { %v887_v33 = vrot.slane %v885_v32, 6 }
0x12f6   :  { %888 = vrot.lane.b32.xlu0 %v887_v33, %s1536_s20 }
0x1368   :  { %v889_v34 = vpop.permute.xlu0 %888 }
0x1369   :  { %1289 = vmatmul.mubr.msk.f32.vlgmr.msra.gmra.mrb[8].mxu0 %vm138_vm2, %v889_v34 }
0x143c   :  { %v958_v35 = vpop.f32.mrb[8].mxu0 }
0x143d   :  { %v963_v36 = vrot.slane %v958_v35, 1  ;;  %v1290_v37 = vpop.f32.mrb[9].mxu0 }
0x143f   :  { %v965_v38 = vadd.f32 %v963_v36, %v1657_v15  ;;  %v1004_v15 = vld [vmem:[%s1799_s4] sm:$0xff]  ;;  %s1538_s4 = smov [#allocation6]  }
0x1440   :  { %v1354_v52 = vpack.c.bf16 %v1005_v50, %v1004_v15  ;;  %s1102_s28 = sshll.u32 %s1538_s4, 4  ;;  %s1103_s28 = int_to_ptr.vmem [resolvable:$true] %s1102_s28 }
0x1441   :  { %1427 = vtanh.f32 %v965_v38  ;;  %v1146_v40 = vmul.f32 -1.442695, %v965_v38  ;;  %s1457_s1 = scalar_lea.vmem %s1103_s28, 16  ;;  %s1461_s29 = scalar_lea.vmem %s1103_s28, 32 }
0x1442   :  { %1355 = vmatpush3.bf16.msra.mxu1 %v1354_v52  ;;  %p1458_p8 = scmp.ne.s32.totalorder %s1103_s28, %s1457_s1  ;;  %p1462_p9 = scmp.lt.s32.totalorder %s1103_s28, %s1103_s28 }
0x1443   :  { %1429 = vpow2.f32 %v1146_v40  ;;  %1356 = vmatprep.subr.bf16.mxu1 %v1532_v0  ;;  %p1463_p10 = scmp.lt.s32.totalorder %s1461_s29, %s1457_s1 }
0x1445   :  { %p1464_p11 = por %p1463_p10, %p1462_p9 }
0x1446   :  { %1358 = vmatpush3.bf16.msra.mxu1 %v1357_v54 }
0x1447   :  { %p1465_p12 = pnand %p1464_p11, %p1458_p8 }
0x144b   :  { %v1428_v39 = vpop.eup %1427 }
0x144c   :  { %978 = vrot.lane.b32.xlu1 %v1428_v39, %s1535_s6 }
0x144d   :  { %v1430_v41 = vpop.eup %1429 }
0x144e   :  { %v969_v42 = vadd.f32 1.0, %v1430_v41 }
0x1450   :  { %1431 = vrcp.f32 %v969_v42 }
0x145a   :  { %v1432_v43 = vpop.eup %1431 }
0x145b   :  { %v976_v47 = vmul.f32 %v1432_v43, %v974_v46 }
0x14be   :  { %v979_v44 = vpop.permute.xlu1 %978 }
0x14bf   :  { %v981_v45 = vmul.f32 %v1432_v43, %v979_v44 }
0x14c1   :  { %983 = vrot.lane.b32.xlu0 %v981_v45, %s1536_s20 }
0x1533   :  { %v984_v48 = vpop.permute.xlu0 %983 }
0x1534   :  { %v986_v49 = vadd.f32 %v984_v48, %v976_v47 }
0x1536   :  { %1433 = vtanh.f32 %v986_v49 }
0x1540   :  { %v1434_v55 = vpop.eup %1433 }
0x1541   :  { %989 = vrot.lane.b32.xlu1 %v1434_v55, %s1535_s6 }
0x15b3   :  { %v990_v56 = vpop.permute.xlu1 %989 }
0x15b4   :  { %v992_v57 = vmul.f32 %v1432_v43, %v990_v56 }
0x15b6   :  { %v1009_v58 = vrot.slane %v992_v57, 7  ;;  %994 = vrot.lane.b32.xlu1 %v992_v57, %s1536_s20 }
0x15b8   :  { %1010 = vrot.lane.b32.xlu0 %v1009_v58, %s1536_s20 }
0x15bc   :  { %1000 = vrot.lane.b32.xlu0 %v986_v49, %s1537_s27 }
0x1628   :  { %v995_v59 = vpop.permute.xlu1 %994 }
0x1629   :  { %998 = vst.msk [vmem:[#allocation6 - $0x7] sm:$0x80] %vm997_vm3, %v995_v59 }
0x162a   :  { %v1011_v60 = vpop.permute.xlu0 %1010 }
0x162b   :  { %1300 = vmatmul.mubr.msk.f32.vlgmr.msra.gmra.mrb[8].mxu1 %vm138_vm2, %v1011_v60 }
0x162e   :  { %v1001_v61 = vpop.permute.xlu0 %1000 }
0x162f   :  { %1003 = vst.msk [vmem:[#allocation8 - $0x7] sm:$0x80] %vm997_vm3, %v1001_v61 }
0x1630   :  { %1468 = shalt.err (!%p1465_p12)
}
0x1631   :  { %s1469_s12 = scalar_lea.hbm %s1804_s9, 16 }
0x1632   :  { %p1470_p13 = scmp.ne.s32.totalorder %s1804_s9, %s1469_s12  ;;  %p1473_p0 = scmp.lt.u32.totalorder %s1469_s12, %s1804_s9 }
0x1634   :  { %p1475_p1 = pnand %p1473_p0, %p1470_p13 }
0x1636   :  { %1478 = shalt.err (!%p1475_p1)
}
0x1637   :  { %1105 = dma.vmem_to_hbm [thread:$0]  %s1103_s28, 16, %s1804_s9, [#allocation7]  }
0x1638   :  { %s1539_s2 = smov [#allocation8]  }
0x1639   :  { %s1112_s6 = sshll.u32 %s1539_s2, 4  ;;  %s1113_s6 = int_to_ptr.vmem [resolvable:$true] %s1112_s6 }
0x163a   :  { %s1479_s18 = scalar_lea.vmem %s1113_s6, 16  ;;  %s1483_s19 = scalar_lea.vmem %s1113_s6, 32 }
0x163b   :  { %p1480_p2 = scmp.ne.s32.totalorder %s1113_s6, %s1479_s18  ;;  %p1484_p3 = scmp.lt.s32.totalorder %s1113_s6, %s1113_s6 }
0x163c   :  { %p1485_p4 = scmp.lt.s32.totalorder %s1483_s19, %s1479_s18 }
0x163e   :  { %p1486_p5 = por %p1485_p4, %p1484_p3 }
0x1640   :  { %p1487_p6 = pnand %p1486_p5, %p1480_p2 }
0x1642   :  { %1490 = shalt.err (!%p1487_p6)
}
0x1643   :  { %s1491_s7 = scalar_lea.hbm %s1805_s10, 16 }
0x1644   :  { %p1492_p7 = scmp.ne.s32.totalorder %s1805_s10, %s1491_s7  ;;  %p1495_p8 = scmp.lt.u32.totalorder %s1491_s7, %s1805_s10 }
0x1646   :  { %p1497_p9 = pnand %p1495_p8, %p1492_p7 }
0x1648   :  { %1500 = shalt.err (!%p1497_p9)
}
0x1649   :  { %1115 = dma.vmem_to_hbm [thread:$0]  %s1113_s6, 16, %s1805_s10, [#allocation7]   ;;  %v1008_v0 = vld [vmem:[%s1800_s5] sm:$0x1]  ;;  %vm1084_vm4 = vcmask 24576  }
0x164a   :  { %s1540_s4 = smov [#allocation5]  }
0x164b   :  { %s1092_s28 = sshll.u32 %s1540_s4, 4  ;;  %s1093_s28 = int_to_ptr.vmem [resolvable:$true] %s1092_s28 }
0x164c   :  { %s1501_s1 = scalar_lea.vmem %s1093_s28, 16  ;;  %s1505_s29 = scalar_lea.vmem %s1093_s28, 32 }
0x164d   :  { %p1502_p10 = scmp.ne.s32.totalorder %s1093_s28, %s1501_s1  ;;  %p1506_p11 = scmp.lt.s32.totalorder %s1093_s28, %s1093_s28 }
0x164e   :  { %p1507_p12 = scmp.lt.s32.totalorder %s1505_s29, %s1501_s1 }
0x1650   :  { %p1508_p13 = por %p1507_p12, %p1506_p11 }
0x1652   :  { %p1509_p0 = pnand %p1508_p13, %p1502_p10 }
0x16fe   :  { %v1080_v62 = vpop.f32.mrb[8].mxu1 }
0x16ff   :  { %v1081_v63 = vadd.f32 %v1080_v62, %v1008_v0  ;;  %v1301_v5 = vpop.f32.mrb[9].mxu1 }
0x1701   :  { %1085 = vst.msk [vmem:[#allocation5] sm:$0x1] %vm1084_vm4, %v1081_v63 }
0x1702   :  { %1512 = shalt.err (!%p1509_p0)
}
0x1703   :  { %s1513_s5 = scalar_lea.hbm %s1803_s8, 16 }
0x1704   :  { %p1514_p1 = scmp.ne.s32.totalorder %s1803_s8, %s1513_s5  ;;  %p1517_p2 = scmp.lt.u32.totalorder %s1513_s5, %s1803_s8 }
0x1706   :  { %p1519_p3 = pnand %p1517_p2, %p1514_p1 }
0x1708   :  { %1522 = shalt.err (!%p1519_p3)
}
0x1709   :  { %1095 = dma.vmem_to_hbm [thread:$0]  %s1093_s28, 16, %s1803_s8, [#allocation4]  }
0x170a   :  { %1525 = dma.done.wait [#allocation4], 16  }
0x170b   :  { %1526 = vsyncadd [#allocation4], 4294967280 }
0x170c   :  { %1527 = dma.done.wait [#allocation7], 32  }
0x170d   :  { %1528 = vsyncadd [#allocation7], 4294967264 }
0x170e   :  { %1125 = vsyncpa [#allocation3], 1 }
0x170f   :  { %1126 = vsyncpa [#allocation4], 1 }
0x1710   :  { %1127 = vsyncpa [#allocation7], 1 }

</bundles_post_ra>
